<compile_context>
chip_gen: v6e
topology: v6e:2x2x1
jax: 0.10.0
libtpu: 0.0.40
codegen_flags: <defaults>
</compile_context>

<pallas_src>
import functools

import jax
import jax.numpy as jnp
from jax import lax
from jax.experimental import pallas as pl
from jax.experimental.pallas import tpu as pltpu

LANE = 128
SUBLANE = 8


def _round_up(n: int, m: int) -> int:
    return ((n + m - 1) // m) * m


def _cdiv(a: int, b: int) -> int:
    return -(-a // b)


def _vmem_capacity_bytes() -> int:
    """Physical VMEM per TensorCore (64 MiB on v7x, 128 MiB on v5e/v6e)."""
    try:
        cap = getattr(pltpu.get_tpu_info(), "vmem_capacity_bytes", None)
        if cap:
            return int(cap)
    except Exception:
        pass
    return 64 * 1024 * 1024  # conservative default (v7x)


def _single_buffered(shape, index_map):
    """BlockSpec for a block that is identical every grid step.

    Requests a single pipeline buffer (no double-buffering) where the JAX
    version supports it; falls back to a plain BlockSpec otherwise.
    """
    try:
        return pl.BlockSpec(shape, index_map, pipeline_mode=pl.Buffered(1))
    except Exception:
        return pl.BlockSpec(shape, index_map)


# --------------------------------------------------------------------------
# Kernels
# --------------------------------------------------------------------------
def _ffn_resident_kernel(x_ref, w1_ref, b1_ref, w2_ref, b2_ref, o_ref, *,
                         precision):
    # (tb, d_in) @ (d_in, h) -> f32 accumulation on the MXU.
    h = jnp.dot(x_ref[...], w1_ref[...],
                preferred_element_type=jnp.float32, precision=precision)
    h = jnp.maximum(h + b1_ref[...], 0.0)           # bias + ReLU in f32 (VPU)
    y = jnp.dot(h.astype(w2_ref.dtype), w2_ref[...],
                preferred_element_type=jnp.float32, precision=precision)
    o_ref[...] = (y + b2_ref[...]).astype(o_ref.dtype)


def _ffn_streamed_kernel(x_ref, w1_ref, b1_ref, w2_ref, b2_ref, o_ref,
                         acc_ref, *, precision):
    # Hidden dimension is streamed on the last ("arbitrary") grid axis.
    # acc += relu(x @ W1[:, kchunk] + b1[kchunk]) @ W2[kchunk, :] is exact
    # because ReLU acts per hidden column.
    k = pl.program_id(1)

    @pl.when(k == 0)
    def _init():
        acc_ref[...] = jnp.zeros_like(acc_ref)

    h = jnp.dot(x_ref[...], w1_ref[...],
                preferred_element_type=jnp.float32, precision=precision)
    h = jnp.maximum(h + b1_ref[...], 0.0)
    acc_ref[...] += jnp.dot(h.astype(w2_ref.dtype), w2_ref[...],
                            preferred_element_type=jnp.float32,
                            precision=precision)

    @pl.when(k == pl.num_programs(1) - 1)
    def _finalize():
        o_ref[...] = (acc_ref[...] + b2_ref[...]).astype(o_ref.dtype)


# --------------------------------------------------------------------------
# Parameter preparation (run ONCE at parameter-load time)
# --------------------------------------------------------------------------
def prepare_ffn_params(w1, b1, w2, b2, *, compute_dtype=jnp.float32,
                       block_b: int = 512, vmem_budget_bytes=None):
    """Pad / cast weights once and pick the execution plan.

    w1: (d_in, h)  transposed PyTorch weight;  b1: (h,)
    w2: (h, d_out) transposed PyTorch weight;  b2: (d_out,)
    compute_dtype: jnp.float32 (PyTorch-parity, precision=HIGHEST dots) or
                   jnp.bfloat16 (fast MXU path on v6e/v7x, halves HBM traffic).
    """
    d_in, h_dim = w1.shape
    d_out = w2.shape[1]
    d_in_p = _round_up(d_in, LANE)
    d_out_p = _round_up(d_out, LANE)
    h_p = _round_up(h_dim, LANE)

    wbytes = jnp.dtype(compute_dtype).itemsize
    if vmem_budget_bytes is None:
        # Leave headroom below physical VMEM for compiler scratch / pipelining.
        vmem_budget_bytes = int(0.7 * _vmem_capacity_bytes())

    tb_max = block_b  # worst-case batch tile used for planning

    def resident_footprint(tb):
        return (2 * tb * d_in_p * wbytes              # x tiles (double-buffered)
                + 2 * tb * d_out_p * 4                # out tiles (f32, double-buffered)
                + (d_in_p * h_p + h_p * d_out_p) * wbytes  # weights, single-buffered
                + (h_p + d_out_p) * 4                 # biases (f32)
                + tb * h_p * 4)                       # (tb, h) f32 intermediate

    if resident_footprint(tb_max) <= vmem_budget_bytes:
        mode, th = "resident", h_p
    else:
        mode = "streamed"
        # Prefer 256-wide hidden chunks: fills the 2x256x256 MXU on v6e/v7x.
        th = max(256, _round_up(min(h_p, 2048), 256))
        th = min(th, _round_up(h_dim, 256))

        def streamed_footprint(tb, th):
            return (2 * tb * d_in_p * wbytes
                    + 2 * tb * d_out_p * 4
                    + 2 * (d_in_p * th + th * d_out_p) * wbytes  # W chunks (pipelined)
                    + 2 * th * 4 + d_out_p * 4                   # biases
                    + tb * d_out_p * 4                           # accumulator scratch
                    + tb * th * 4)                               # (tb, th) intermediate

        while th > 256 and streamed_footprint(tb_max, th) > vmem_budget_bytes:
            th = max(256, th // 2)
        # TODO(synk): if it still does not fit, block_b should be reduced too.
        h_p = _round_up(h_dim, th)  # hidden padded to a multiple of the chunk

    # Zero padding is exact through Linear->ReLU->Linear: padded hidden columns
    # are relu(0)=0 and multiply zero rows of W2; padded outputs are sliced off.
    w1_p = jnp.pad(w1, ((0, d_in_p - d_in), (0, h_p - h_dim))).astype(compute_dtype)
    b1_p = jnp.pad(b1, (0, h_p - h_dim)).astype(jnp.float32).reshape(1, h_p)
    w2_p = jnp.pad(w2, ((0, h_p - h_dim), (0, d_out_p - d_out))).astype(compute_dtype)
    b2_p = jnp.pad(b2, (0, d_out_p - d_out)).astype(jnp.float32).reshape(1, d_out_p)

    # f32 parity with PyTorch needs HIGHEST (otherwise the MXU uses a reduced-
    # precision pass); bf16 operands use the default single-pass path.
    f32 = jnp.dtype(compute_dtype) == jnp.dtype(jnp.float32)
    precision = lax.Precision.HIGHEST if f32 else None

    return dict(w1=w1_p, b1=b1_p, w2=w2_p, b2=b2_p,
                d_in=d_in, d_out=d_out,
                d_in_p=d_in_p, h_p=h_p, d_out_p=d_out_p, th=th,
                mode=mode, compute_dtype=compute_dtype, block_b=block_b,
                precision=precision)


# --------------------------------------------------------------------------
# Per-call apply
# --------------------------------------------------------------------------
def ffn_apply(x, params):
    """Fused Linear -> ReLU -> Linear forward. x: (..., d_in) float."""
    lead_shape = x.shape[:-1]
    x2 = x.reshape(-1, x.shape[-1])
    B, d_in = x2.shape
    assert d_in == params["d_in"], "input feature dim mismatch"

    d_in_p, h_p, d_out_p = params["d_in_p"], params["h_p"], params["d_out_p"]
    d_out = params["d_out"]
    compute_dtype = params["compute_dtype"]
    precision = params["precision"]
    block_b = params["block_b"]
    w1_p, b1_p, w2_p, b2_p = params["w1"], params["b1"], params["w2"], params["b2"]

    # Batch tiling: derive the tile from the tile count (waste < 8 rows/tile),
    # and use >= 2 steps when possible so both v7x TensorCores get work.
    n_b = _cdiv(B, block_b)
    if n_b == 1 and B > SUBLANE:
        n_b = 2
    tb = _round_up(_cdiv(B, n_b), SUBLANE)
    b_p = n_b * tb

    x_p = x2.astype(compute_dtype)
    if (b_p, d_in_p) != (B, d_in):
        x_p = jnp.pad(x_p, ((0, b_p - B), (0, d_in_p - d_in)))

    xbytes = jnp.dtype(compute_dtype).itemsize
    flops = 2 * b_p * (d_in_p * h_p + h_p * d_out_p)
    bytes_accessed = (b_p * d_in_p * xbytes
                      + (d_in_p * h_p + h_p * d_out_p) * xbytes
                      + (h_p + d_out_p) * 4
                      + b_p * d_out_p * 4)
    cost = pl.CostEstimate(flops=flops, bytes_accessed=bytes_accessed,
                           transcendentals=0)

    vmem_limit = min(int(0.9 * _vmem_capacity_bytes()), 128 * 1024 * 1024)

    if params["mode"] == "resident":
        grid = (n_b,)
        kernel = functools.partial(_ffn_resident_kernel, precision=precision)
        in_specs = [
            # x: one batch tile per step (pipelined HBM<->VMEM).
            pl.BlockSpec((tb, d_in_p), lambda i: (i, 0)),
            # Weights / biases: same block every step -> VMEM-resident,
            # single-buffered (no wasted second pipeline buffer).
            _single_buffered((d_in_p, h_p), lambda i: (0, 0)),
            _single_buffered((1, h_p), lambda i: (0, 0)),
            _single_buffered((h_p, d_out_p), lambda i: (0, 0)),
            _single_buffered((1, d_out_p), lambda i: (0, 0)),
        ]
        out_specs = pl.BlockSpec((tb, d_out_p), lambda i: (i, 0))
        scratch_shapes = []
        dim_sem = ("parallel",)
    else:
        th = params["th"]
        grid = (n_b, h_p // th)  # hidden (reduction) axis last
        kernel = functools.partial(_ffn_streamed_kernel, precision=precision)
        in_specs = [
            pl.BlockSpec((tb, d_in_p), lambda i, k: (i, 0)),
            pl.BlockSpec((d_in_p, th), lambda i, k: (0, k)),
            pl.BlockSpec((1, th), lambda i, k: (0, k)),
            pl.BlockSpec((th, d_out_p), lambda i, k: (k, 0)),
            _single_buffered((1, d_out_p), lambda i, k: (0, 0)),
        ]
        out_specs = pl.BlockSpec((tb, d_out_p), lambda i, k: (i, 0))
        scratch_shapes = [pltpu.VMEM((tb, d_out_p), jnp.float32)]
        dim_sem = ("parallel", "arbitrary")

    out_p = pl.pallas_call(
        kernel,
        out_shape=jax.ShapeDtypeStruct((b_p, d_out_p), jnp.float32),
        grid_spec=pltpu.PrefetchScalarGridSpec(
            num_scalar_prefetch=0,
            grid=grid,
            in_specs=in_specs,
            out_specs=out_specs,
            scratch_shapes=scratch_shapes,
        ),
        compiler_params=pltpu.CompilerParams(
            dimension_semantics=dim_sem,
            vmem_limit_bytes=vmem_limit),
        cost_estimate=cost,
    )(x_p, w1_p, b1_p, w2_p, b2_p)

    if (b_p, d_out_p) != (B, d_out):
        out_p = out_p[:B, :d_out]
    return out_p.reshape(*lead_shape, d_out)


def feed_forward_net(x, w1, b1, w2, b2, **kwargs):
    """Convenience one-shot wrapper (pads weights every call; prefer
    prepare_ffn_params + ffn_apply in a real training/inference loop)."""
    return ffn_apply(x, prepare_ffn_params(w1, b1, w2, b2, **kwargs))


def _ref(x, w1, b1, w2, b2):
    return jnp.maximum(x @ w1 + b1, 0.0) @ w2 + b2


if __name__ == "__main__":
    # Small shapes implied by the module: x is (batch, input_dim).
    batch, input_dim, hidden_dim, output_dim = 8, 16, 32, 8

    key = jax.random.PRNGKey(0)
    kx, kw1, kb1, kw2, kb2 = jax.random.split(key, 5)

    x = jax.random.normal(kx, (batch, input_dim), dtype=jnp.float32)
    # Deterministic synthetic params, stored pre-transposed (in, out).
    w1 = jax.random.normal(kw1, (input_dim, hidden_dim), dtype=jnp.float32) * 0.1
    b1 = jax.random.normal(kb1, (hidden_dim,), dtype=jnp.float32) * 0.1
    w2 = jax.random.normal(kw2, (hidden_dim, output_dim), dtype=jnp.float32) * 0.1
    b2 = jax.random.normal(kb2, (output_dim,), dtype=jnp.float32) * 0.1

    # 1) Resident (weights-in-VMEM) path, f32 parity precision.
    params = prepare_ffn_params(w1, b1, w2, b2)
    out = ffn_apply(x, params)
    jax.block_until_ready(out)
    ref = _ref(x, w1, b1, w2, b2)
    assert out.shape == (batch, output_dim)
    assert jnp.allclose(out, ref, atol=1e-5, rtol=1e-5)

    # 2) Multi-step batch grid (tiling + padding + pipelining, >=2 steps).
    x_big = jax.random.normal(jax.random.fold_in(kx, 1), (40, input_dim),
                              dtype=jnp.float32)
    out_big = ffn_apply(x_big, prepare_ffn_params(w1, b1, w2, b2, block_b=16))
    jax.block_until_ready(out_big)
    ref_big = _ref(x_big, w1, b1, w2, b2)
    assert out_big.shape == (40, output_dim)
    assert jnp.allclose(out_big, ref_big, atol=1e-5, rtol=1e-5)

    # 3) Streamed hidden-axis path with bf16 MXU operands (the large-layer /
    #    fast path); forced here via a tiny VMEM budget so it runs at toy size.
    params_s = prepare_ffn_params(w1, b1, w2, b2, compute_dtype=jnp.bfloat16,
                                  block_b=16, vmem_budget_bytes=1)
    assert params_s["mode"] == "streamed"
    out_s = ffn_apply(x_big, params_s)
    jax.block_until_ready(out_s)
    assert out_s.shape == (40, output_dim)
    assert jnp.allclose(out_s, ref_big, atol=5e-2, rtol=5e-2)

    print("KERNEL_OK")
</pallas_src>

<mosaic_0001>
module attributes {stable_mosaic.version = 11 : i64} {
  func.func @_ffn_resident_kernel(%arg0: i32, %arg1: memref<8x128xf32, #tpu.memory_space<vmem>>, %arg2: memref<128x128xf32, #tpu.memory_space<vmem>>, %arg3: memref<1x128xf32, #tpu.memory_space<vmem>>, %arg4: memref<128x128xf32, #tpu.memory_space<vmem>>, %arg5: memref<1x128xf32, #tpu.memory_space<vmem>>, %arg6: memref<8x128xf32, #tpu.memory_space<vmem>>) attributes {dimension_semantics = [#tpu.dimension_semantics<parallel>], iteration_bounds = array<i64: 1>, scalar_prefetch = 0 : i64, scratch_operands = 0 : i64, tpu.core_type = #tpu.core_type<tc>, window_params = [{transform_indices = @transform_0, window_bounds = array<i64: 8, 128>}, {pipeline_mode = #tpu.pipeline_mode<synchronous>, transform_indices = @transform_1, window_bounds = array<i64: 128, 128>}, {pipeline_mode = #tpu.pipeline_mode<synchronous>, transform_indices = @transform_2, window_bounds = array<i64: 1, 128>}, {pipeline_mode = #tpu.pipeline_mode<synchronous>, transform_indices = @transform_3, window_bounds = array<i64: 128, 128>}, {pipeline_mode = #tpu.pipeline_mode<synchronous>, transform_indices = @transform_4, window_bounds = array<i64: 1, 128>}, {transform_indices = @transform_5, window_bounds = array<i64: 8, 128>}]} {
    %c0 = arith.constant 0 : index
    %c0_0 = arith.constant 0 : index
    %0 = vector.load %arg1[%c0, %c0_0] : memref<8x128xf32, #tpu.memory_space<vmem>>, vector<8x128xf32>
    %c0_1 = arith.constant 0 : index
    %c0_2 = arith.constant 0 : index
    %1 = vector.load %arg2[%c0_1, %c0_2] : memref<128x128xf32, #tpu.memory_space<vmem>>, vector<128x128xf32>
    %cst = arith.constant dense<0.000000e+00> : vector<8x128xf32>
    %2 = tpu.matmul %0, %1, %cst {dimension_numbers = #tpu.dot_dimension_numbers<[1], [0], [0], [1], [0, 0, 1, 1], [], []>, precision = #tpu.contract_precision<fp32>} : vector<8x128xf32>, vector<128x128xf32>, vector<8x128xf32> -> vector<8x128xf32>
    %c0_3 = arith.constant 0 : index
    %c0_4 = arith.constant 0 : index
    %3 = vector.load %arg3[%c0_3, %c0_4] : memref<1x128xf32, #tpu.memory_space<vmem>>, vector<1x128xf32>
    %4 = vector.broadcast %3 : vector<1x128xf32> to vector<8x128xf32>
    %5 = arith.addf %2, %4 : vector<8x128xf32>
    %cst_5 = arith.constant 0.000000e+00 : f32
    %6 = vector.broadcast %cst_5 : f32 to vector<8x128xf32>
    %7 = arith.maximumf %5, %6 : vector<8x128xf32>
    %c0_6 = arith.constant 0 : index
    %c0_7 = arith.constant 0 : index
    %8 = vector.load %arg4[%c0_6, %c0_7] : memref<128x128xf32, #tpu.memory_space<vmem>>, vector<128x128xf32>
    %cst_8 = arith.constant dense<0.000000e+00> : vector<8x128xf32>
    %9 = tpu.matmul %7, %8, %cst_8 {dimension_numbers = #tpu.dot_dimension_numbers<[1], [0], [0], [1], [0, 0, 1, 1], [], []>, precision = #tpu.contract_precision<fp32>} : vector<8x128xf32>, vector<128x128xf32>, vector<8x128xf32> -> vector<8x128xf32>
    %c0_9 = arith.constant 0 : index
    %c0_10 = arith.constant 0 : index
    %10 = vector.load %arg5[%c0_9, %c0_10] : memref<1x128xf32, #tpu.memory_space<vmem>>, vector<1x128xf32>
    %11 = vector.broadcast %10 : vector<1x128xf32> to vector<8x128xf32>
    %12 = arith.addf %9, %11 : vector<8x128xf32>
    %c0_11 = arith.constant 0 : index
    %c0_12 = arith.constant 0 : index
    %13 = vector.load %arg6[%c0_11, %c0_12] : memref<8x128xf32, #tpu.memory_space<vmem>>, vector<8x128xf32>
    tpu.vector_store %arg6[%c0_11, %c0_12], %12 {strides = array<i32>} : memref<8x128xf32, #tpu.memory_space<vmem>>, vector<8x128xf32>,
    return
  }
  func.func @transform_0(%arg0: i32) -> (i32, i32) {
    %c0_i32 = arith.constant 0 : i32
    %c0_i32_0 = arith.constant 0 : i32
    return %arg0, %c0_i32 : i32, i32
  }
  func.func @transform_1(%arg0: i32) -> (i32, i32) {
    %c0_i32 = arith.constant 0 : i32
    %c0_i32_0 = arith.constant 0 : i32
    %c0_i32_1 = arith.constant 0 : i32
    return %c0_i32, %c0_i32_0 : i32, i32
  }
  func.func @transform_2(%arg0: i32) -> (i32, i32) {
    %c0_i32 = arith.constant 0 : i32
    %c0_i32_0 = arith.constant 0 : i32
    %c0_i32_1 = arith.constant 0 : i32
    return %c0_i32, %c0_i32_0 : i32, i32
  }
  func.func @transform_3(%arg0: i32) -> (i32, i32) {
    %c0_i32 = arith.constant 0 : i32
    %c0_i32_0 = arith.constant 0 : i32
    %c0_i32_1 = arith.constant 0 : i32
    return %c0_i32, %c0_i32_0 : i32, i32
  }
  func.func @transform_4(%arg0: i32) -> (i32, i32) {
    %c0_i32 = arith.constant 0 : i32
    %c0_i32_0 = arith.constant 0 : i32
    %c0_i32_1 = arith.constant 0 : i32
    return %c0_i32, %c0_i32_0 : i32, i32
  }
  func.func @transform_5(%arg0: i32) -> (i32, i32) {
    %c0_i32 = arith.constant 0 : i32
    %c0_i32_0 = arith.constant 0 : i32
    return %arg0, %c0_i32 : i32, i32
  }
}

</mosaic_0001>

<bundles_post_ra>
// kernel: tpu_custom_call.1
= control target key start
LH: loop header
LB: loop body
LE: loop exit
PB: predicated region body
PF: predicated region fallthrough
CT: control target
= control target key end

     0   :  { %10 = vsyncpa [#allocation3], 0  ;;  %s2905_s0 = inlined_call_operand.hbm [shape: f32[8,128], index: 0, kind: input, shape index: {}]   ;;  %s2906_s1 = inlined_call_operand.hbm [shape: f32[128,128], index: 1, kind: input, shape index: {}]   ;;  %s2907_s2 = inlined_call_operand.vmem [shape: f32[1,128], index: 2, kind: input, shape index: {}]   ;;  %s2908_s3 = inlined_call_operand.hbm [shape: f32[128,128], index: 3, kind: input, shape index: {}]   ;;  %s2909_s4 = inlined_call_operand.vmem [shape: f32[1,128], index: 4, kind: input, shape index: {}]   ;;  %s2910_s5 = inlined_call_operand.hbm [shape: f32[8,128], index: 5, kind: output, shape index: {}]  }
   0x1   :  { %11 = vsyncpa [#allocation6], 0 }
   0x2   :  { %12 = vsyncpa [#allocation4], 0  ;;  %s2127_s18 = smov [#allocation5]  }
   0x3   :  { %s28_s19 = sshll.u32 %s2127_s18, 4  ;;  %s29_s19 = int_to_ptr.vmem [resolvable:$true] %s28_s19 }
   0x4   :  { %s2049_s20 = scalar_lea.vmem %s29_s19, 2048  ;;  %p2054_p1 = scmp.lt.s32.totalorder %s29_s19, %s29_s19 }
   0x5   :  { %p2050_p0 = scmp.ne.s32.totalorder %s29_s19, %s2049_s20  ;;  %p2055_p2 = scmp.lt.s32.totalorder %s2049_s20, %s2049_s20 }
   0x7   :  { %p2056_p3 = por %p2055_p2, %p2054_p1 }
   0x9   :  { %p2057_p4 = pnand %p2056_p3, %p2050_p0 }
   0xb   :  { %2060 = shalt.err (!%p2057_p4)
}
   0xc   :  { %s2128_s21 = smov 128   ;;  %s2129_s22 = smov 8  }
   0xd   :  { %34 = dma.hbm_to_vmem [thread:$0]  %s2906_s1, 2048, %s29_s19, [#allocation6], %s2128_s21, %s2128_s21, %s2129_s22  }
   0xe   :  { %s2130_s25 = smov [#allocation2]   ;;  %s2131_s27 = smov [#allocation7]  }
   0xf   :  { %s19_s26 = sshll.u32 %s2130_s25, 4  ;;  %s42_s28 = sshll.u32 %s2131_s27, 4  ;;  %s20_s26 = int_to_ptr.vmem [resolvable:$true] %s19_s26  ;;  %s43_s28 = int_to_ptr.vmem [resolvable:$true] %s42_s28 }
  0x10   :  { %s2069_s29 = scalar_lea.vmem %s20_s26, 128  ;;  %p2074_p6 = scmp.lt.s32.totalorder %s20_s26, %s20_s26 }
  0x11   :  { %p2070_p5 = scmp.ne.s32.totalorder %s20_s26, %s2069_s29  ;;  %p2075_p7 = scmp.lt.s32.totalorder %s2069_s29, %s2069_s29 }
  0x13   :  { %p2076_p8 = por %p2075_p7, %p2074_p6 }
  0x15   :  { %p2077_p9 = pnand %p2076_p8, %p2070_p5 }
  0x17   :  { %2080 = shalt.err (!%p2077_p9)
}
  0x18   :  { %22 = dma.hbm_to_vmem [thread:$0]  %s2905_s0, 128, %s20_s26, [#allocation3]  }
  0x19   :  { %s2089_s7 = scalar_lea.vmem %s43_s28, 2048  ;;  %p2094_p11 = scmp.lt.s32.totalorder %s43_s28, %s43_s28 }
  0x1a   :  { %p2090_p10 = scmp.ne.s32.totalorder %s43_s28, %s2089_s7  ;;  %p2095_p12 = scmp.lt.s32.totalorder %s2089_s7, %s2089_s7 }
  0x1c   :  { %p2096_p13 = por %p2095_p12, %p2094_p11 }
  0x1e   :  { %p2097_p0 = pnand %p2096_p13, %p2090_p10 }
  0x20   :  { %2100 = shalt.err (!%p2097_p0)
}
  0x21   :  { %48 = dma.hbm_to_vmem [thread:$0]  %s2908_s3, 2048, %s43_s28, [#allocation6], %s2128_s21, %s2128_s21, %s2129_s22  }
  0x22   :  { %2121 = dma.done.wait [#allocation3], 128  }
  0x23   :  { %2122 = vsyncadd [#allocation3], 4294967168 }
  0x24   :  { %2123 = dma.done.wait [#allocation6], 4096  }
  0x25   :  { %2124 = vsyncadd [#allocation6], 4294963200  ;;  %v2132_v0 = vmov 0.0   ;;  %vm2133_vm0 = vmmov 0   ;;  %v76_v1 = vld [vmem:[#allocation5 + $0x78] sm:$0xff]  ;;  %v75_v2 = vld [vmem:[#allocation5 + $0x70] sm:$0xff] }
  0x26   :  { %1613 = vmatprep.subr.mxu0 %v2132_v0  ;;  %1648 = vmatprep.subr.mxu1 %v2132_v0  ;;  %v74_v3 = vld [vmem:[#allocation5 + $0x68] sm:$0xff]  ;;  %v2180_v4 = vand.u32 4294901760, %v76_v1  ;;  %v2182_v5 = vand.u32 4294901760, %v75_v2  ;;  %v73_v7 = vld [vmem:[#allocation5 + $0x60] sm:$0xff]  ;;  %v72_v8 = vld [vmem:[#allocation5 + $0x58] sm:$0xff]  ;;  %s2134_s10 = smov [#allocation8]  }
  0x27   :  { %1645 = vmatprep.mubr.msk.f32.mxu0 %vm2133_vm0, %v2132_v0  ;;  %1680 = vmatprep.mubr.msk.f32.mxu1 %vm2133_vm0, %v2132_v0  ;;  %v2184_v6 = vand.u32 4294901760, %v74_v3  ;;  %v71_v9 = vld [vmem:[#allocation5 + $0x50] sm:$0xff]  ;;  %v2186_v10 = vand.u32 4294901760, %v73_v7  ;;  %v2188_v11 = vand.u32 4294901760, %v72_v8  ;;  %v70_v13 = vld [vmem:[#allocation5 + $0x48] sm:$0xff]  ;;  %v69_v14 = vld [vmem:[#allocation5 + $0x40] sm:$0xff] }
  0x28   :  { %v2190_v12 = vand.u32 4294901760, %v71_v9  ;;  %1614 = vmatpush3.msra.mxu0 %v2180_v4  ;;  %v2194_v15 = vsub.f32 %v76_v1, %v2180_v4  ;;  %v2197_v16 = vsub.f32 %v75_v2, %v2182_v5  ;;  %v2199_v17 = vand.u32 4294901760, %v70_v13  ;;  %v68_v19 = vld [vmem:[#allocation5 + $0x38] sm:$0xff]  ;;  %v67_v26 = vld [vmem:[#allocation5 + $0x30] sm:$0xff]  ;;  %v66_v36 = vld [vmem:[#allocation5 + $0x28] sm:$0xff]  ;;  %s1397_s11 = sshll.u32 %s2134_s10, 4  ;;  %s1398_s11 = int_to_ptr.vmem [resolvable:$true] %s1397_s11 }
  0x29   :  { %v2202_v18 = vsub.f32 %v74_v3, %v2184_v6  ;;  %1615 = vmatprep.subr.mxu0 %v2132_v0  ;;  %v2206_v20 = vsub.f32 %v73_v7, %v2186_v10  ;;  %v2209_v21 = vsub.f32 %v72_v8, %v2188_v11  ;;  %v2215_v25 = vand.u32 4294901760, %v69_v14  ;;  %v65_v41 = vld [vmem:[#allocation5 + $0x20] sm:$0xff]  ;;  %v64_v49 = vld [vmem:[#allocation5 + $0x18] sm:$0xff]  ;;  %v63_v54 = vld [vmem:[#allocation5 + $0x10] sm:$0xff]  ;;  %s2101_s12 = scalar_lea.vmem %s1398_s11, 128  ;;  %p2106_p2 = scmp.lt.s32.totalorder %s1398_s11, %s1398_s11 }
  0x2a   :  { %1616 = vmatpush3.msra.mxu0 %v2182_v5  ;;  %v178_v22 = vand.u32 4294901760, %v2194_v15  ;;  %v185_v23 = vand.u32 4294901760, %v2197_v16  ;;  %v2219_v28 = vand.u32 4294901760, %v68_v19  ;;  %v2223_v30 = vsub.f32 %v71_v9, %v2190_v12  ;;  %v60_v50 = vld [vmem:[#allocation2] sm:$0xff]  ;;  %v62_v60 = vld [vmem:[#allocation5 + $0x8] sm:$0xff]  ;;  %v61_v7 = vld [vmem:[#allocation5] sm:$0xff]  ;;  %p2102_p1 = scmp.ne.s32.totalorder %s1398_s11, %s2101_s12  ;;  %p2107_p3 = scmp.lt.s32.totalorder %s2101_s12, %s2101_s12 }
  0x2b   :  { %v192_v24 = vand.u32 4294901760, %v2202_v18  ;;  %1617 = vmatprep.subr.mxu0 %v2132_v0  ;;  %v199_v27 = vand.u32 4294901760, %v2206_v20  ;;  %v206_v29 = vand.u32 4294901760, %v2209_v21  ;;  %v2236_v34 = vsub.f32 %v70_v13, %v2199_v17 }
  0x2c   :  { %1618 = vmatpush3.msra.mxu0 %v2184_v6  ;;  %v179_v31 = vsub.f32 %v2194_v15, %v178_v22  ;;  %v186_v32 = vsub.f32 %v2197_v16, %v185_v23  ;;  %v2239_v35 = vand.u32 4294901760, %v67_v26  ;;  %v213_v40 = vand.u32 4294901760, %v2223_v30  ;;  %p2108_p4 = por %p2107_p3, %p2106_p2 }
  0x2d   :  { %v193_v33 = vsub.f32 %v2202_v18, %v192_v24  ;;  %1619 = vmatprep.subr.mxu0 %v2132_v0  ;;  %v200_v39 = vsub.f32 %v2206_v20, %v199_v27  ;;  %v207_v42 = vsub.f32 %v2209_v21, %v206_v29  ;;  %v2251_v43 = vsub.f32 %v69_v14, %v2215_v25 }
  0x2e   :  { %1620 = vmatpush3.msra.mxu0 %v2186_v10  ;;  %v180_v37 = vand.u32 4294901760, %v179_v31  ;;  %v187_v38 = vand.u32 4294901760, %v186_v32  ;;  %v2254_v45 = vand.u32 4294901760, %v66_v36  ;;  %v220_v46 = vand.u32 4294901760, %v2236_v34  ;;  %p2109_p5 = pnand %p2108_p4, %p2102_p1 }
  0x2f   :  { %1621 = vmatprep.subr.mxu0 %v2132_v0  ;;  %v194_v44 = vand.u32 4294901760, %v193_v33  ;;  %v2258_v47 = vsub.f32 %v68_v19, %v2219_v28  ;;  %v2262_v48 = vand.u32 4294901760, %v65_v41  ;;  %v201_v51 = vand.u32 4294901760, %v200_v39 }
  0x30   :  { %1622 = vmatpush3.msra.mxu0 %v2188_v11  ;;  %1649 = vmatpush3.msra.mxu1 %v180_v37  ;;  %v214_v52 = vsub.f32 %v2223_v30, %v213_v40  ;;  %v227_v53 = vand.u32 4294901760, %v2251_v43  ;;  %v2270_v55 = vsub.f32 %v67_v26, %v2239_v35  ;;  %v208_v56 = vand.u32 4294901760, %v207_v42 }
  0x31   :  { %1623 = vmatprep.subr.mxu0 %v2132_v0  ;;  %1650 = vmatprep.subr.mxu1 %v2132_v0  ;;  %v234_v57 = vand.u32 4294901760, %v2258_v47  ;;  %v221_v58 = vsub.f32 %v2236_v34, %v220_v46  ;;  %v2279_v59 = vand.u32 4294901760, %v64_v49  ;;  %v2282_v61 = vsub.f32 %v66_v36, %v2254_v45 }
  0x32   :  { %1624 = vmatpush3.msra.mxu0 %v2190_v12  ;;  %1651 = vmatpush3.msra.mxu1 %v187_v38  ;;  %v2284_v62 = vand.u32 4294901760, %v60_v50  ;;  %v2288_v63 = vand.u32 4294901760, %v63_v54  ;;  %v215_v1 = vand.u32 4294901760, %v214_v52  ;;  %v228_v2 = vsub.f32 %v2251_v43, %v227_v53 }
  0x33   :  { %1625 = vmatprep.subr.mxu0 %v2132_v0  ;;  %1652 = vmatprep.subr.mxu1 %v2132_v0  ;;  %v241_v3 = vand.u32 4294901760, %v2270_v55  ;;  %v2296_v8 = vsub.f32 %v65_v41, %v2262_v48  ;;  %v235_v9 = vsub.f32 %v2258_v47, %v234_v57  ;;  %v2303_v13 = vand.u32 4294901760, %v62_v60 }
  0x34   :  { %1626 = vmatpush3.msra.mxu0 %v2199_v17  ;;  %1653 = vmatpush3.msra.mxu1 %v194_v44  ;;  %v222_v14 = vand.u32 4294901760, %v221_v58  ;;  %v248_v19 = vand.u32 4294901760, %v2282_v61  ;;  %v2308_v26 = vsub.f32 %v60_v50, %v2284_v62  ;;  %v2311_v31 = vsub.f32 %v64_v49, %v2279_v59 }
  0x35   :  { %1627 = vmatprep.subr.mxu0 %v2132_v0  ;;  %1654 = vmatprep.subr.mxu1 %v2132_v0  ;;  %v2315_v32 = vand.u32 4294901760, %v61_v7  ;;  %v229_v33 = vand.u32 4294901760, %v228_v2  ;;  %v242_v36 = vsub.f32 %v2270_v55, %v241_v3  ;;  %v255_v37 = vand.u32 4294901760, %v2296_v8 }
  0x36   :  { %1628 = vmatpush3.msra.mxu0 %v2215_v25  ;;  %1655 = vmatpush3.msra.mxu1 %v201_v51  ;;  %v2323_v38 = vsub.f32 %v63_v54, %v2288_v63  ;;  %v236_v39 = vand.u32 4294901760, %v235_v9  ;;  %v249_v41 = vsub.f32 %v2282_v61, %v248_v19  ;;  %v167_v42 = vand.u32 4294901760, %v2308_v26 }
  0x37   :  { %1629 = vmatprep.subr.mxu0 %v2132_v0  ;;  %1656 = vmatprep.subr.mxu1 %v2132_v0  ;;  %v262_v44 = vand.u32 4294901760, %v2311_v31  ;;  %v2334_v49 = vsub.f32 %v62_v60, %v2303_v13  ;;  %v243_v50 = vand.u32 4294901760, %v242_v36  ;;  %v256_v51 = vsub.f32 %v2296_v8, %v255_v37 }
  0x38   :  { %1630 = vmatpush3.msra.mxu0 %v2219_v28  ;;  %1657 = vmatpush3.msra.mxu1 %v208_v56  ;;  %v269_v52 = vand.u32 4294901760, %v2323_v38  ;;  %v2344_v54 = vsub.f32 %v61_v7, %v2315_v32  ;;  %v250_v56 = vand.u32 4294901760, %v249_v41  ;;  %v168_v58 = vsub.f32 %v2308_v26, %v167_v42 }
  0x39   :  { %1631 = vmatprep.subr.mxu0 %v2132_v0  ;;  %1658 = vmatprep.subr.mxu1 %v2132_v0  ;;  %v263_v60 = vsub.f32 %v2311_v31, %v262_v44  ;;  %v257_v2 = vand.u32 4294901760, %v256_v51 }
  0x3a   :  { %1632 = vmatpush3.msra.mxu0 %v2239_v35  ;;  %1659 = vmatpush3.msra.mxu1 %v215_v1  ;;  %v276_v1 = vand.u32 4294901760, %v2334_v49  ;;  %v270_v7 = vsub.f32 %v2323_v38, %v269_v52  ;;  %v283_v9 = vand.u32 4294901760, %v2344_v54 }
  0x3b   :  { %1633 = vmatprep.subr.mxu0 %v2132_v0  ;;  %1660 = vmatprep.subr.mxu1 %v2132_v0 }
  0x3c   :  { %1634 = vmatpush3.msra.mxu0 %v2254_v45  ;;  %1661 = vmatpush3.msra.mxu1 %v222_v14  ;;  %v169_v14 = vand.u32 4294901760, %v168_v58  ;;  %v277_v36 = vsub.f32 %v2334_v49, %v276_v1  ;;  %v284_v41 = vsub.f32 %v2344_v54, %v283_v9  ;;  %v732_v58 = vld [vmem:[#allocation7 + $0x30] sm:$0xff] }
  0x3d   :  { %1635 = vmatprep.subr.mxu0 %v2132_v0  ;;  %1662 = vmatprep.subr.mxu1 %v2132_v0 }
  0x3e   :  { %1636 = vmatpush3.msra.mxu0 %v2262_v48  ;;  %1663 = vmatpush3.msra.mxu1 %v229_v33  ;;  %v264_v33 = vand.u32 4294901760, %v263_v60  ;;  %v285_v51 = vand.u32 4294901760, %v284_v41 }
  0x3f   :  { %1637 = vmatprep.subr.mxu0 %v2132_v0  ;;  %1664 = vmatprep.subr.mxu1 %v2132_v0 }
  0x40   :  { %1638 = vmatpush3.msra.mxu0 %v2279_v59  ;;  %1665 = vmatpush3.msra.mxu1 %v236_v39  ;;  %v271_v39 = vand.u32 4294901760, %v270_v7  ;;  %v731_v7 = vld [vmem:[#allocation7 + $0x28] sm:$0xff] }
  0x41   :  { %1639 = vmatprep.subr.mxu0 %v2132_v0  ;;  %1666 = vmatprep.subr.mxu1 %v2132_v0 }
  0x42   :  { %1640 = vmatpush3.msra.mxu0 %v2288_v63  ;;  %1667 = vmatpush3.msra.mxu1 %v243_v50  ;;  %v278_v50 = vand.u32 4294901760, %v277_v36  ;;  %v730_v36 = vld [vmem:[#allocation7 + $0x20] sm:$0xff] }
  0x43   :  { %1641 = vmatprep.subr.mxu0 %v2132_v0  ;;  %1668 = vmatprep.subr.mxu1 %v2132_v0 }
  0x44   :  { %1642 = vmatpush3.msra.mxu0 %v2303_v13  ;;  %1669 = vmatpush3.msra.mxu1 %v250_v56 }
  0x45   :  { %1643 = vmatprep.subr.mxu0 %v2132_v0  ;;  %1670 = vmatprep.subr.mxu1 %v2132_v0 }
  0x46   :  { %1644 = vmatpush3.msra.mxu0 %v2315_v32  ;;  %1671 = vmatpush3.msra.mxu1 %v257_v2  ;;  %v2643_v2 = vand.u32 4294901760, %v732_v58 }
  0x47   :  { %1672 = vmatprep.subr.mxu1 %v2132_v0  ;;  %1683 = vmatprep.subr.mxu0 %v2132_v0 }
  0x48   :  { %1646 = vmatmul.mubr.f32.vlgmr.msra.gmra.mxu0 %v169_v14  ;;  %1673 = vmatpush3.msra.mxu1 %v264_v33  ;;  %v2649_v14 = vsub.f32 %v732_v58, %v2643_v2  ;;  %v2651_v33 = vand.u32 4294901760, %v731_v7 }
  0x49   :  { %1684 = vmatpush3.msra.mxu0 %v2194_v15  ;;  %1674 = vmatprep.subr.mxu1 %v2132_v0  ;;  %v738_v15 = vld [vmem:[#allocation7 + $0x60] sm:$0xff] }
  0x4a   :  { %1685 = vmatprep.subr.mxu0 %v2132_v0  ;;  %1675 = vmatpush3.msra.mxu1 %v271_v39  ;;  %v906_v41 = vand.u32 4294901760, %v2649_v14 }
  0x4b   :  { %1686 = vmatpush3.msra.mxu0 %v2197_v16  ;;  %1676 = vmatprep.subr.mxu1 %v2132_v0  ;;  %v737_v16 = vld [vmem:[#allocation7 + $0x58] sm:$0xff] }
  0x4c   :  { %1687 = vmatprep.subr.mxu0 %v2132_v0  ;;  %1677 = vmatpush3.msra.mxu1 %v278_v50  ;;  %v2658_v50 = vsub.f32 %v731_v7, %v2651_v33 }
  0x4d   :  { %1688 = vmatpush3.msra.mxu0 %v2202_v18  ;;  %1678 = vmatprep.subr.mxu1 %v2132_v0 }
  0x4e   :  { %1689 = vmatprep.subr.mxu0 %v2132_v0  ;;  %1679 = vmatpush3.msra.mxu1 %v285_v51  ;;  %v2660_v51 = vand.u32 4294901760, %v730_v36 }
  0x4f   :  { %1690 = vmatpush3.msra.mxu0 %v2206_v20  ;;  %1681 = vmatmul.mubr.f32.vlgmr.msra.gmra.mxu1 %v2284_v62 }
  0x50   :  { %1691 = vmatprep.subr.mxu0 %v2132_v0  ;;  %1718 = vmatprep.subr.mxu1 %v2132_v0 }
  0x51   :  { %1692 = vmatpush3.msra.mxu0 %v2209_v21  ;;  %1719 = vmatpush3.msra.mxu1 %v2180_v4  ;;  %v2558_v21 = vand.u32 4294901760, %v738_v15 }
  0x52   :  { %1693 = vmatprep.subr.mxu0 %v2132_v0  ;;  %1720 = vmatprep.subr.mxu1 %v2132_v0 }
  0x53   :  { %1694 = vmatpush3.msra.mxu0 %v2223_v30  ;;  %1721 = vmatpush3.msra.mxu1 %v2182_v5 }
  0x54   :  { %1695 = vmatprep.subr.mxu0 %v2132_v0  ;;  %1722 = vmatprep.subr.mxu1 %v2132_v0 }
  0x55   :  { %1696 = vmatpush3.msra.mxu0 %v2236_v34  ;;  %1723 = vmatpush3.msra.mxu1 %v2184_v6 }
  0x56   :  { %1697 = vmatprep.subr.mxu0 %v2132_v0  ;;  %1724 = vmatprep.subr.mxu1 %v2132_v0 }
  0x57   :  { %1698 = vmatpush3.msra.mxu0 %v2251_v43  ;;  %1725 = vmatpush3.msra.mxu1 %v2186_v10 }
  0x58   :  { %1699 = vmatprep.subr.mxu0 %v2132_v0  ;;  %1726 = vmatprep.subr.mxu1 %v2132_v0 }
  0x59   :  { %1700 = vmatpush3.msra.mxu0 %v2258_v47  ;;  %1727 = vmatpush3.msra.mxu1 %v2188_v11 }
  0x5a   :  { %1701 = vmatprep.subr.mxu0 %v2132_v0  ;;  %1728 = vmatprep.subr.mxu1 %v2132_v0 }
  0x5b   :  { %1702 = vmatpush3.msra.mxu0 %v2270_v55  ;;  %1729 = vmatpush3.msra.mxu1 %v2190_v12 }
  0x5c   :  { %1703 = vmatprep.subr.mxu0 %v2132_v0  ;;  %1730 = vmatprep.subr.mxu1 %v2132_v0 }
  0x5d   :  { %1704 = vmatpush3.msra.mxu0 %v2282_v61  ;;  %1731 = vmatpush3.msra.mxu1 %v2199_v17 }
  0x5e   :  { %1705 = vmatprep.subr.mxu0 %v2132_v0  ;;  %1732 = vmatprep.subr.mxu1 %v2132_v0 }
  0x5f   :  { %1706 = vmatpush3.msra.mxu0 %v2296_v8  ;;  %1733 = vmatpush3.msra.mxu1 %v2215_v25 }
  0x60   :  { %1707 = vmatprep.subr.mxu0 %v2132_v0  ;;  %1734 = vmatprep.subr.mxu1 %v2132_v0 }
  0x61   :  { %1708 = vmatpush3.msra.mxu0 %v2311_v31  ;;  %1735 = vmatpush3.msra.mxu1 %v2219_v28 }
  0x62   :  { %1709 = vmatprep.subr.mxu0 %v2132_v0  ;;  %1736 = vmatprep.subr.mxu1 %v2132_v0 }
  0x63   :  { %1710 = vmatpush3.msra.mxu0 %v2323_v38  ;;  %1737 = vmatpush3.msra.mxu1 %v2239_v35 }
  0x64   :  { %1711 = vmatprep.subr.mxu0 %v2132_v0  ;;  %1738 = vmatprep.subr.mxu1 %v2132_v0 }
  0x65   :  { %1712 = vmatpush3.msra.mxu0 %v2334_v49  ;;  %1739 = vmatpush3.msra.mxu1 %v2254_v45 }
  0x66   :  { %1713 = vmatprep.subr.mxu0 %v2132_v0  ;;  %1740 = vmatprep.subr.mxu1 %v2132_v0 }
  0x67   :  { %1714 = vmatpush3.msra.mxu0 %v2344_v54  ;;  %1715 = vmatprep.mubr.msk.f32.mxu0 %vm2133_vm0, %v2132_v0 }
  0x68   :  { %1741 = vmatpush3.msra.mxu1 %v2262_v48  ;;  %1716 = vmatmul.mubr.f32.vlgmr.msra.gmra.mxu0 %v2308_v26 }
  0x69   :  { %1742 = vmatprep.subr.mxu1 %v2132_v0  ;;  %1753 = vmatprep.subr.mxu0 %v2132_v0 }
  0x6a   :  { %1743 = vmatpush3.msra.mxu1 %v2279_v59  ;;  %1754 = vmatpush3.msra.mxu0 %v178_v22  ;;  %v736_v22 = vld [vmem:[#allocation7 + $0x50] sm:$0xff] }
  0x6b   :  { %1744 = vmatprep.subr.mxu1 %v2132_v0  ;;  %1755 = vmatprep.subr.mxu0 %v2132_v0 }
  0x6c   :  { %1745 = vmatpush3.msra.mxu1 %v2288_v63  ;;  %1756 = vmatpush3.msra.mxu0 %v185_v23  ;;  %v735_v23 = vld [vmem:[#allocation7 + $0x48] sm:$0xff] }
  0x6d   :  { %1746 = vmatprep.subr.mxu1 %v2132_v0  ;;  %1757 = vmatprep.subr.mxu0 %v2132_v0 }
  0x6e   :  { %1747 = vmatpush3.msra.mxu1 %v2303_v13  ;;  %1758 = vmatpush3.msra.mxu0 %v192_v24  ;;  %v734_v24 = vld [vmem:[#allocation7 + $0x40] sm:$0xff] }
  0x6f   :  { %1748 = vmatprep.subr.mxu1 %v2132_v0  ;;  %1759 = vmatprep.subr.mxu0 %v2132_v0 }
  0x70   :  { %1749 = vmatpush3.msra.mxu1 %v2315_v32  ;;  %1750 = vmatprep.mubr.msk.f32.mxu1 %vm2133_vm0, %v2132_v0 }
  0x71   :  { %1760 = vmatpush3.msra.mxu0 %v199_v27  ;;  %1751 = vmatmul.mubr.f32.vlgmr.msra.gmra.mxu1 %v167_v42  ;;  %v2563_v27 = vand.u32 4294901760, %v736_v22 }
  0x72   :  { %1761 = vmatprep.subr.mxu0 %v2132_v0  ;;  %1788 = vmatprep.subr.mxu1 %v2132_v0 }
  0x73   :  { %1762 = vmatpush3.msra.mxu0 %v206_v29  ;;  %1789 = vmatpush3.msra.mxu1 %v2180_v4  ;;  %v741_v4 = vld [vmem:[#allocation7 + $0x78] sm:$0xff]  ;;  %v2568_v29 = vand.u32 4294901760, %v734_v24 }
  0x74   :  { %1763 = vmatprep.subr.mxu0 %v2132_v0  ;;  %1790 = vmatprep.subr.mxu1 %v2132_v0 }
  0x75   :  { %1764 = vmatpush3.msra.mxu0 %v213_v40  ;;  %1791 = vmatpush3.msra.mxu1 %v2182_v5  ;;  %v2543_v5 = vand.u32 4294901760, %v741_v4  ;;  %v2578_v40 = vsub.f32 %v738_v15, %v2558_v21  ;;  %v2592_v47 = vsub.f32 %v734_v24, %v2568_v29  ;;  %v2670_v15 = vsub.f32 %v730_v36, %v2660_v51 }
  0x76   :  { %1765 = vmatprep.subr.mxu0 %v2132_v0  ;;  %1792 = vmatprep.subr.mxu1 %v2132_v0 }
  0x77   :  { %1766 = vmatpush3.msra.mxu0 %v220_v46  ;;  %1793 = vmatpush3.msra.mxu1 %v2184_v6  ;;  %v740_v6 = vld [vmem:[#allocation7 + $0x70] sm:$0xff]  ;;  %v892_v31 = vand.u32 4294901760, %v2592_v47 }
  0x78   :  { %1767 = vmatprep.subr.mxu0 %v2132_v0  ;;  %1794 = vmatprep.subr.mxu1 %v2132_v0 }
  0x79   :  { %1768 = vmatpush3.msra.mxu0 %v227_v53  ;;  %1795 = vmatpush3.msra.mxu1 %v2186_v10  ;;  %v2546_v10 = vsub.f32 %v741_v4, %v2543_v5  ;;  %v893_v56 = vsub.f32 %v2592_v47, %v892_v31  ;;  %v729_v4 = vld [vmem:[#allocation7 + $0x18] sm:$0xff] }
  0x7a   :  { %1769 = vmatprep.subr.mxu0 %v2132_v0  ;;  %1796 = vmatprep.subr.mxu1 %v2132_v0 }
  0x7b   :  { %1770 = vmatpush3.msra.mxu0 %v234_v57  ;;  %1797 = vmatpush3.msra.mxu1 %v2188_v11  ;;  %v2548_v11 = vand.u32 4294901760, %v740_v6 }
  0x7c   :  { %1771 = vmatprep.subr.mxu0 %v2132_v0  ;;  %1798 = vmatprep.subr.mxu1 %v2132_v0 }
  0x7d   :  { %1772 = vmatpush3.msra.mxu0 %v241_v3  ;;  %1799 = vmatpush3.msra.mxu1 %v2190_v12  ;;  %v739_v12 = vld [vmem:[#allocation7 + $0x68] sm:$0xff]  ;;  %v2554_v18 = vsub.f32 %v740_v6, %v2548_v11  ;;  %v907_v6 = vsub.f32 %v2649_v14, %v906_v41 }
  0x7e   :  { %1773 = vmatprep.subr.mxu0 %v2132_v0  ;;  %1800 = vmatprep.subr.mxu1 %v2132_v0  ;;  %v2556_v20 = vand.u32 4294901760, %v739_v12 }
  0x7f   :  { %1774 = vmatpush3.msra.mxu0 %v248_v19  ;;  %1801 = vmatpush3.msra.mxu1 %v2199_v17  ;;  %v843_v17 = vand.u32 4294901760, %v2546_v10  ;;  %v850_v34 = vand.u32 4294901760, %v2554_v18 }
  0x80   :  { %1775 = vmatprep.subr.mxu0 %v2132_v0  ;;  %1802 = vmatprep.subr.mxu1 %v2132_v0 }
  0x81   :  { %1776 = vmatpush3.msra.mxu0 %v255_v37  ;;  %1803 = vmatpush3.msra.mxu1 %v2215_v25  ;;  %v2561_v25 = vand.u32 4294901760, %v737_v16  ;;  %v844_v30 = vsub.f32 %v2546_v10, %v843_v17  ;;  %v851_v55 = vsub.f32 %v2554_v18, %v850_v34 }
  0x82   :  { %1777 = vmatprep.subr.mxu0 %v2132_v0  ;;  %1804 = vmatprep.subr.mxu1 %v2132_v0 }
  0x83   :  { %1778 = vmatpush3.msra.mxu0 %v262_v44  ;;  %1805 = vmatpush3.msra.mxu1 %v2219_v28  ;;  %v2566_v28 = vand.u32 4294901760, %v735_v23  ;;  %v2582_v43 = vsub.f32 %v737_v16, %v2561_v25  ;;  %v845_v53 = vand.u32 4294901760, %v844_v30  ;;  %v852_v3 = vand.u32 4294901760, %v851_v55  ;;  %v727_v55 = vld [vmem:[#allocation7 + $0x8] sm:$0xff] }
  0x84   :  { %1779 = vmatprep.subr.mxu0 %v2132_v0  ;;  %1806 = vmatprep.subr.mxu1 %v2132_v0  ;;  %v2672_v16 = vand.u32 4294901760, %v729_v4  ;;  %v920_v30 = vand.u32 4294901760, %v2670_v15 }
  0x85   :  { %1780 = vmatpush3.msra.mxu0 %v269_v52  ;;  %1807 = vmatpush3.msra.mxu1 %v2239_v35  ;;  %v2575_v35 = vsub.f32 %v739_v12, %v2556_v20  ;;  %v2588_v46 = vsub.f32 %v735_v23, %v2566_v28  ;;  %v871_v61 = vand.u32 4294901760, %v2582_v43  ;;  %v913_v12 = vand.u32 4294901760, %v2658_v50 }
  0x86   :  { %1781 = vmatprep.subr.mxu0 %v2132_v0  ;;  %1808 = vmatprep.subr.mxu1 %v2132_v0  ;;  %v908_v23 = vand.u32 4294901760, %v907_v6 }
  0x87   :  { %1782 = vmatpush3.msra.mxu0 %v276_v1  ;;  %1809 = vmatpush3.msra.mxu1 %v2254_v45  ;;  %v2585_v45 = vsub.f32 %v736_v22, %v2563_v27  ;;  %v857_v57 = vand.u32 4294901760, %v2575_v35  ;;  %v872_v26 = vsub.f32 %v2582_v43, %v871_v61  ;;  %v728_v22 = vld [vmem:[#allocation7 + $0x10] sm:$0xff]  ;;  %v914_v24 = vsub.f32 %v2658_v50, %v913_v12 }
  0x88   :  { %1783 = vmatprep.subr.mxu0 %v2132_v0  ;;  %1810 = vmatprep.subr.mxu1 %v2132_v0 }
  0x89   :  { %1784 = vmatpush3.msra.mxu0 %v283_v9  ;;  %1785 = vmatprep.mubr.msk.f32.mxu0 %vm2133_vm0, %v2132_v0  ;;  %v858_v8 = vsub.f32 %v2575_v35, %v857_v57  ;;  %v873_v44 = vand.u32 4294901760, %v872_v26  ;;  %v894_v9 = vand.u32 4294901760, %v893_v56  ;;  %v2693_v26 = vand.u32 4294901760, %v727_v55 }
  0x8a   :  { %1811 = vmatpush3.msra.mxu1 %v2262_v48  ;;  %1786 = vmatmul.mubr.f32.vlgmr.msra.gmra.mxu0 %v2284_v62  ;;  %v733_v48 = vld [vmem:[#allocation7 + $0x38] sm:$0xff] }
  0x8b   :  { %1812 = vmatprep.subr.mxu1 %v2132_v0  ;;  %1820 = vmatprep.mubr.msk.f32.mxu1 %vm2133_vm0, %v2132_v0  ;;  %v2611_v19 = vand.u32 4294901760, %v733_v48 }
  0x8c   :  { %1813 = vmatpush3.msra.mxu1 %v2279_v59  ;;  %1823 = vmatprep.subr.mxu0 %v2132_v0  ;;  %v864_v59 = vand.u32 4294901760, %v2578_v40 }
  0x8d   :  { %1814 = vmatprep.subr.mxu1 %v2132_v0  ;;  %1855 = vmatprep.mubr.msk.f32.mxu0 %vm2133_vm0, %v2132_v0  ;;  %v2622_v42 = vsub.f32 %v733_v48, %v2611_v19  ;;  %v2682_v48 = vsub.f32 %v729_v4, %v2672_v16 }
  0x8e   :  { %1815 = vmatpush3.msra.mxu1 %v2288_v63  ;;  %1824 = vmatpush3.msra.mxu0 %v2543_v5  ;;  %v885_v63 = vand.u32 4294901760, %v2588_v46 }
  0x8f   :  { %1816 = vmatprep.subr.mxu1 %v2132_v0  ;;  %1825 = vmatprep.subr.mxu0 %v2132_v0  ;;  %v899_v52 = vand.u32 4294901760, %v2622_v42 }
  0x90   :  { %1817 = vmatpush3.msra.mxu1 %v2303_v13  ;;  %1826 = vmatpush3.msra.mxu0 %v2548_v11  ;;  %v865_v13 = vsub.f32 %v2578_v40, %v864_v59  ;;  %v886_v49 = vsub.f32 %v2588_v46, %v885_v63 }
  0x91   :  { %1818 = vmatprep.subr.mxu1 %v2132_v0  ;;  %1827 = vmatprep.subr.mxu0 %v2132_v0  ;;  %v900_v1 = vsub.f32 %v2622_v42, %v899_v52 }
  0x92   :  { %1819 = vmatpush3.msra.mxu1 %v2315_v32  ;;  %1828 = vmatpush3.msra.mxu0 %v2556_v20  ;;  %v859_v32 = vand.u32 4294901760, %v858_v8  ;;  %v866_v37 = vand.u32 4294901760, %v865_v13  ;;  %v887_v60 = vand.u32 4294901760, %v886_v49  ;;  %v921_v8 = vsub.f32 %v2670_v15, %v920_v30 }
  0x93   :  { %1821 = vmatmul.mubr.f32.vlgmr.msra.gmra.mxu1 %v2284_v62  ;;  %1858 = vmatprep.subr.mxu1 %v2132_v0  ;;  %v878_v62 = vand.u32 4294901760, %v2585_v45  ;;  %v901_v39 = vand.u32 4294901760, %v900_v1  ;;  %v2914_v13 = vand.u32 4294901760, %v2682_v48  ;;  %v2705_v49 = vsub.f32 %v727_v55, %v2693_v26 }
  0x94   :  { %1890 = vmatprep.mubr.msk.f32.mxu1 %vm2133_vm0, %v2132_v0  ;;  %1829 = vmatprep.subr.mxu0 %v2132_v0 }
  0x95   :  { %1830 = vmatpush3.msra.mxu0 %v2558_v21  ;;  %1859 = vmatpush3.msra.mxu1 %v845_v53  ;;  %v879_v38 = vsub.f32 %v2585_v45, %v878_v62  ;;  %v2686_v53 = vand.u32 4294901760, %v728_v22 }
  0x96   :  { %1831 = vmatprep.subr.mxu0 %v2132_v0  ;;  %1860 = vmatprep.subr.mxu1 %v2132_v0 }
  0x97   :  { %1832 = vmatpush3.msra.mxu0 %v2561_v25  ;;  %1861 = vmatpush3.msra.mxu1 %v852_v3  ;;  %v880_v54 = vand.u32 4294901760, %v879_v38  ;;  %v915_v3 = vand.u32 4294901760, %v914_v24  ;;  %v922_v38 = vand.u32 4294901760, %v921_v8 }
  0x98   :  { %1833 = vmatprep.subr.mxu0 %v2132_v0  ;;  %1862 = vmatprep.subr.mxu1 %v2132_v0 }
  0x99   :  { %1834 = vmatpush3.msra.mxu0 %v2563_v27  ;;  %1863 = vmatpush3.msra.mxu1 %v859_v32  ;;  %v2698_v32 = vsub.f32 %v728_v22, %v2686_v53 }
  0x9a   :  { %1835 = vmatprep.subr.mxu0 %v2132_v0  ;;  %1864 = vmatprep.subr.mxu1 %v2132_v0 }
  0x9b   :  { %1836 = vmatpush3.msra.mxu0 %v2566_v28  ;;  %1865 = vmatpush3.msra.mxu1 %v866_v37  ;;  %v726_v37 = vld [vmem:[#allocation7] sm:$0xff]  ;;  %v2913_v56 = vand.u32 4294901760, %v2698_v32 }
  0x9c   :  { %1837 = vmatprep.subr.mxu0 %v2132_v0  ;;  %1866 = vmatprep.subr.mxu1 %v2132_v0 }
  0x9d   :  { %1838 = vmatpush3.msra.mxu0 %v2568_v29  ;;  %1867 = vmatpush3.msra.mxu1 %v873_v44  ;;  %v928_v44 = vsub.f32 %v2682_v48, %v2914_v13  ;;  %v935_v7 = vsub.f32 %v2698_v32, %v2913_v56 }
  0x9e   :  { %1839 = vmatprep.subr.mxu0 %v2132_v0  ;;  %1868 = vmatprep.subr.mxu1 %v2132_v0 }
  0x9f   :  { %1840 = vmatpush3.msra.mxu0 %v2611_v19  ;;  %1869 = vmatpush3.msra.mxu1 %v880_v54  ;;  %v2707_v54 = vand.u32 4294901760, %v726_v37  ;;  %v929_v58 = vand.u32 4294901760, %v928_v44 }
  0xa0   :  { %1841 = vmatprep.subr.mxu0 %v2132_v0  ;;  %1870 = vmatprep.subr.mxu1 %v2132_v0 }
  0xa1   :  { %1842 = vmatpush3.msra.mxu0 %v2643_v2  ;;  %1871 = vmatpush3.msra.mxu1 %v887_v60  ;;  %v2912_v60 = vand.u32 4294901760, %v2705_v49  ;;  %v2715_v1 = vsub.f32 %v726_v37, %v2707_v54 }
  0xa2   :  { %1843 = vmatprep.subr.mxu0 %v2132_v0  ;;  %1872 = vmatprep.subr.mxu1 %v2132_v0 }
  0xa3   :  { %1844 = vmatpush3.msra.mxu0 %v2651_v33  ;;  %1873 = vmatpush3.msra.mxu1 %v894_v9  ;;  %v942_v9 = vsub.f32 %v2705_v49, %v2912_v60  ;;  %v2911_v36 = vand.u32 4294901760, %v2715_v1 }
  0xa4   :  { %1845 = vmatprep.subr.mxu0 %v2132_v0  ;;  %1874 = vmatprep.subr.mxu1 %v2132_v0 }
  0xa5   :  { %1846 = vmatpush3.msra.mxu0 %v2660_v51  ;;  %1875 = vmatpush3.msra.mxu1 %v901_v39  ;;  %v936_v39 = vand.u32 4294901760, %v935_v7  ;;  %v943_v4 = vand.u32 4294901760, %v942_v9  ;;  %v949_v6 = vsub.f32 %v2715_v1, %v2911_v36 }
  0xa6   :  { %1847 = vmatprep.subr.mxu0 %v2132_v0  ;;  %1876 = vmatprep.subr.mxu1 %v2132_v0 }
  0xa7   :  { %1848 = vmatpush3.msra.mxu0 %v2672_v16  ;;  %1877 = vmatpush3.msra.mxu1 %v908_v23  ;;  %v950_v22 = vand.u32 4294901760, %v949_v6 }
  0xa8   :  { %1849 = vmatprep.subr.mxu0 %v2132_v0  ;;  %1878 = vmatprep.subr.mxu1 %v2132_v0 }
  0xa9   :  { %1850 = vmatpush3.msra.mxu0 %v2686_v53  ;;  %1879 = vmatpush3.msra.mxu1 %v915_v3 }
  0xaa   :  { %1851 = vmatprep.subr.mxu0 %v2132_v0  ;;  %1880 = vmatprep.subr.mxu1 %v2132_v0 }
  0xab   :  { %1852 = vmatpush3.msra.mxu0 %v2693_v26  ;;  %1881 = vmatpush3.msra.mxu1 %v922_v38 }
  0xac   :  { %1853 = vmatprep.subr.mxu0 %v2132_v0  ;;  %1882 = vmatprep.subr.mxu1 %v2132_v0 }
  0xad   :  { %1854 = vmatpush3.msra.mxu0 %v2707_v54  ;;  %1883 = vmatpush3.msra.mxu1 %v929_v58  ;;  %v1407_v58 = vld [vmem:[%s2907_s2] ss:$0 sm:$0xff] }
  0xae   :  { %1893 = vmatprep.subr.mxu0 %v2132_v0  ;;  %1884 = vmatprep.subr.mxu1 %v2132_v0 }
  0xaf   :  { %1885 = vmatpush3.msra.mxu1 %v936_v39 }
  0xb0   :  { %1886 = vmatprep.subr.mxu1 %v2132_v0 }
  0xb1   :  { %1887 = vmatpush3.msra.mxu1 %v943_v4 }
  0xb2   :  { %1888 = vmatprep.subr.mxu1 %v2132_v0 }
  0xb3   :  { %1889 = vmatpush3.msra.mxu1 %v950_v22 }
  0xb4   :  { %1928 = vmatprep.subr.mxu1 %v2132_v0 }
 0x108   :  { %v171_v23 = vpop.f32.mrf.mxu0 }
 0x109   :  { %v172_v7 = vadd.f32 %v1407_v58, %v171_v23 }
 0x10a   :  { %v1647_v24 = vpop.f32.mrf.mxu0 }
 0x10f   :  { %v322_v55 = vpop.f32.mrf.mxu1 }
 0x110   :  { %v323_v39 = vadd.f32 %v322_v55, %v172_v7 }
 0x111   :  { %v1682_v3 = vpop.f32.mrf.mxu1 }
 0x128   :  { %v426_v8 = vpop.f32.mrf.mxu0 }
 0x129   :  { %v427_v6 = vadd.f32 %v426_v8, %v323_v39 }
 0x12a   :  { %v1717_v37 = vpop.f32.mrf.mxu0 }
 0x131   :  { %v515_v38 = vpop.f32.mrf.mxu1 }
 0x132   :  { %v516_v22 = vadd.f32 %v515_v38, %v427_v6 }
 0x133   :  { %v1752_v44 = vpop.f32.mrf.mxu1 }
 0x14a   :  { %v634_v9 = vpop.f32.mrf.mxu0 }
 0x14b   :  { %v635_v36 = vadd.f32 %v634_v9, %v516_v22 }
 0x14c   :  { %v1787_v4 = vpop.f32.mrf.mxu0 }
 0x153   :  { %v721_v60 = vpop.f32.mrf.mxu1 }
 0x154   :  { %v722_v56 = vadd.f32 %v721_v60, %v635_v36 }
 0x155   :  { %v1822_v24 = vpop.f32.mrf.mxu1 }
 0x156   :  { %v725_v13 = vmax.f32 %v722_v56, 0.0 }
 0x158   :  { %v2738_v3 = vand.u32 4294901760, %v725_v13 }
 0x15a   :  { %v2741_v37 = vsub.f32 %v725_v13, %v2738_v3  ;;  %1891 = vmatmul.mubr.f32.vlgmr.msra.gmra.mxu1 %v2738_v3 }
 0x15b   :  { %1929 = vmatpush3.msra.mxu1 %v2543_v5  ;;  %1960 = vmatprep.mubr.msk.f32.mxu1 %vm2133_vm0, %v2132_v0 }
 0x15c   :  { %v832_v23 = vand.u32 4294901760, %v2741_v37  ;;  %1930 = vmatprep.subr.mxu1 %v2132_v0 }
 0x15d   :  { %1931 = vmatpush3.msra.mxu1 %v2548_v11 }
 0x15e   :  { %v833_v56 = vsub.f32 %v2741_v37, %v832_v23  ;;  %1932 = vmatprep.subr.mxu1 %v2132_v0 }
 0x15f   :  { %1933 = vmatpush3.msra.mxu1 %v2556_v20 }
 0x160   :  { %1934 = vmatprep.subr.mxu1 %v2132_v0  ;;  %v834_v13 = vand.u32 4294901760, %v833_v56 }
 0x161   :  { %1935 = vmatpush3.msra.mxu1 %v2558_v21 }
 0x162   :  { %1936 = vmatprep.subr.mxu1 %v2132_v0  ;;  %1856 = vmatmul.mubr.f32.vlgmr.msra.gmra.mxu0 %v834_v13 }
 0x163   :  { %1894 = vmatpush3.msra.mxu0 %v2546_v10  ;;  %1937 = vmatpush3.msra.mxu1 %v2561_v25  ;;  %v2916_v10 = vand.u32 4294901760, %v2698_v32 }
 0x164   :  { %1895 = vmatprep.subr.mxu0 %v2132_v0  ;;  %1938 = vmatprep.subr.mxu1 %v2132_v0 }
 0x165   :  { %1896 = vmatpush3.msra.mxu0 %v2554_v18  ;;  %1939 = vmatpush3.msra.mxu1 %v2563_v27 }
 0x166   :  { %1897 = vmatprep.subr.mxu0 %v2132_v0  ;;  %1940 = vmatprep.subr.mxu1 %v2132_v0 }
 0x167   :  { %1898 = vmatpush3.msra.mxu0 %v2575_v35  ;;  %1941 = vmatpush3.msra.mxu1 %v2566_v28  ;;  %v1408_v35 = vld [vmem:[%s2909_s4] ss:$0 sm:$0xff] }
 0x168   :  { %1899 = vmatprep.subr.mxu0 %v2132_v0  ;;  %1942 = vmatprep.subr.mxu1 %v2132_v0 }
 0x169   :  { %1900 = vmatpush3.msra.mxu0 %v2578_v40  ;;  %1943 = vmatpush3.msra.mxu1 %v2568_v29 }
 0x16a   :  { %1901 = vmatprep.subr.mxu0 %v2132_v0  ;;  %1944 = vmatprep.subr.mxu1 %v2132_v0 }
 0x16b   :  { %1902 = vmatpush3.msra.mxu0 %v2582_v43  ;;  %1945 = vmatpush3.msra.mxu1 %v2611_v19 }
 0x16c   :  { %1903 = vmatprep.subr.mxu0 %v2132_v0  ;;  %1946 = vmatprep.subr.mxu1 %v2132_v0 }
 0x16d   :  { %1904 = vmatpush3.msra.mxu0 %v2585_v45  ;;  %1947 = vmatpush3.msra.mxu1 %v2643_v2 }
 0x16e   :  { %1905 = vmatprep.subr.mxu0 %v2132_v0  ;;  %1948 = vmatprep.subr.mxu1 %v2132_v0 }
 0x16f   :  { %1906 = vmatpush3.msra.mxu0 %v2588_v46  ;;  %1949 = vmatpush3.msra.mxu1 %v2651_v33 }
 0x170   :  { %1907 = vmatprep.subr.mxu0 %v2132_v0  ;;  %1950 = vmatprep.subr.mxu1 %v2132_v0 }
 0x171   :  { %1908 = vmatpush3.msra.mxu0 %v2592_v47  ;;  %1951 = vmatpush3.msra.mxu1 %v2660_v51 }
 0x172   :  { %1909 = vmatprep.subr.mxu0 %v2132_v0  ;;  %1952 = vmatprep.subr.mxu1 %v2132_v0 }
 0x173   :  { %1910 = vmatpush3.msra.mxu0 %v2622_v42  ;;  %1953 = vmatpush3.msra.mxu1 %v2672_v16 }
 0x174   :  { %1911 = vmatprep.subr.mxu0 %v2132_v0  ;;  %1954 = vmatprep.subr.mxu1 %v2132_v0 }
 0x175   :  { %1912 = vmatpush3.msra.mxu0 %v2649_v14  ;;  %1955 = vmatpush3.msra.mxu1 %v2686_v53 }
 0x176   :  { %1913 = vmatprep.subr.mxu0 %v2132_v0  ;;  %1956 = vmatprep.subr.mxu1 %v2132_v0 }
 0x177   :  { %1914 = vmatpush3.msra.mxu0 %v2658_v50  ;;  %1957 = vmatpush3.msra.mxu1 %v2693_v26 }
 0x178   :  { %1915 = vmatprep.subr.mxu0 %v2132_v0  ;;  %1958 = vmatprep.subr.mxu1 %v2132_v0 }
 0x179   :  { %1916 = vmatpush3.msra.mxu0 %v2670_v15  ;;  %1959 = vmatpush3.msra.mxu1 %v2707_v54 }
 0x17a   :  { %1917 = vmatprep.subr.mxu0 %v2132_v0  ;;  %1961 = vmatmul.mubr.f32.vlgmr.msra.gmra.mxu1 %v832_v23 }
 0x17b   :  { %1998 = vmatprep.subr.mxu1 %v2132_v0  ;;  %1918 = vmatpush3.msra.mxu0 %v2682_v48 }
 0x17c   :  { %1999 = vmatpush3.msra.mxu1 %v2543_v5  ;;  %1919 = vmatprep.subr.mxu0 %v2132_v0  ;;  %v2915_v5 = vand.u32 4294901760, %v2682_v48 }
 0x17d   :  { %2000 = vmatprep.subr.mxu1 %v2132_v0  ;;  %1920 = vmatpush3.msra.mxu0 %v2698_v32 }
 0x17e   :  { %2001 = vmatpush3.msra.mxu1 %v2548_v11  ;;  %1921 = vmatprep.subr.mxu0 %v2132_v0  ;;  %v2917_v11 = vand.u32 4294901760, %v2705_v49 }
 0x17f   :  { %2002 = vmatprep.subr.mxu1 %v2132_v0  ;;  %1922 = vmatpush3.msra.mxu0 %v2705_v49 }
 0x180   :  { %2003 = vmatpush3.msra.mxu1 %v2556_v20  ;;  %1923 = vmatprep.subr.mxu0 %v2132_v0 }
 0x181   :  { %2004 = vmatprep.subr.mxu1 %v2132_v0  ;;  %1924 = vmatpush3.msra.mxu0 %v2715_v1 }
 0x182   :  { %1925 = vmatprep.mubr.msk.f32.mxu0 %vm2133_vm0, %v2132_v0  ;;  %2005 = vmatpush3.msra.mxu1 %v2558_v21 }
 0x183   :  { %1926 = vmatmul.mubr.f32.vlgmr.msra.gmra.mxu0 %v2741_v37  ;;  %1963 = vmatprep.subr.mxu0 %v2132_v0 }
 0x184   :  { %2006 = vmatprep.subr.mxu1 %v2132_v0  ;;  %1964 = vmatpush3.msra.mxu0 %v843_v17  ;;  %v2918_v17 = vand.u32 4294901760, %v2715_v1 }
 0x185   :  { %2007 = vmatpush3.msra.mxu1 %v2561_v25  ;;  %1965 = vmatprep.subr.mxu0 %v2132_v0 }
 0x186   :  { %2008 = vmatprep.subr.mxu1 %v2132_v0  ;;  %1966 = vmatpush3.msra.mxu0 %v850_v34 }
 0x187   :  { %2009 = vmatpush3.msra.mxu1 %v2563_v27  ;;  %1967 = vmatprep.subr.mxu0 %v2132_v0 }
 0x188   :  { %2010 = vmatprep.subr.mxu1 %v2132_v0  ;;  %1968 = vmatpush3.msra.mxu0 %v857_v57 }
 0x189   :  { %2011 = vmatpush3.msra.mxu1 %v2566_v28  ;;  %1969 = vmatprep.subr.mxu0 %v2132_v0 }
 0x18a   :  { %2012 = vmatprep.subr.mxu1 %v2132_v0  ;;  %1970 = vmatpush3.msra.mxu0 %v864_v59 }
 0x18b   :  { %2013 = vmatpush3.msra.mxu1 %v2568_v29  ;;  %1971 = vmatprep.subr.mxu0 %v2132_v0 }
 0x18c   :  { %2014 = vmatprep.subr.mxu1 %v2132_v0  ;;  %1972 = vmatpush3.msra.mxu0 %v871_v61 }
 0x18d   :  { %2015 = vmatpush3.msra.mxu1 %v2611_v19  ;;  %1973 = vmatprep.subr.mxu0 %v2132_v0 }
 0x18e   :  { %2016 = vmatprep.subr.mxu1 %v2132_v0  ;;  %1974 = vmatpush3.msra.mxu0 %v878_v62 }
 0x18f   :  { %2017 = vmatpush3.msra.mxu1 %v2643_v2  ;;  %1975 = vmatprep.subr.mxu0 %v2132_v0 }
 0x190   :  { %2018 = vmatprep.subr.mxu1 %v2132_v0  ;;  %1976 = vmatpush3.msra.mxu0 %v885_v63 }
 0x191   :  { %2019 = vmatpush3.msra.mxu1 %v2651_v33  ;;  %1977 = vmatprep.subr.mxu0 %v2132_v0 }
 0x192   :  { %2020 = vmatprep.subr.mxu1 %v2132_v0  ;;  %1978 = vmatpush3.msra.mxu0 %v892_v31 }
 0x193   :  { %2021 = vmatpush3.msra.mxu1 %v2660_v51  ;;  %1979 = vmatprep.subr.mxu0 %v2132_v0 }
 0x194   :  { %2022 = vmatprep.subr.mxu1 %v2132_v0  ;;  %1980 = vmatpush3.msra.mxu0 %v899_v52 }
 0x195   :  { %2023 = vmatpush3.msra.mxu1 %v2672_v16  ;;  %1981 = vmatprep.subr.mxu0 %v2132_v0 }
 0x196   :  { %2024 = vmatprep.subr.mxu1 %v2132_v0  ;;  %1982 = vmatpush3.msra.mxu0 %v906_v41 }
 0x197   :  { %2025 = vmatpush3.msra.mxu1 %v2686_v53  ;;  %1983 = vmatprep.subr.mxu0 %v2132_v0 }
 0x198   :  { %2026 = vmatprep.subr.mxu1 %v2132_v0  ;;  %1984 = vmatpush3.msra.mxu0 %v913_v12 }
 0x199   :  { %2027 = vmatpush3.msra.mxu1 %v2693_v26  ;;  %1985 = vmatprep.subr.mxu0 %v2132_v0 }
 0x19a   :  { %2028 = vmatprep.subr.mxu1 %v2132_v0  ;;  %1986 = vmatpush3.msra.mxu0 %v920_v30 }
 0x19b   :  { %2029 = vmatpush3.msra.mxu1 %v2707_v54  ;;  %2030 = vmatprep.mubr.msk.f32.mxu1 %vm2133_vm0, %v2132_v0 }
 0x19c   :  { %1987 = vmatprep.subr.mxu0 %v2132_v0  ;;  %2031 = vmatmul.mubr.f32.vlgmr.msra.gmra.mxu1 %v2738_v3 }
 0x19d   :  { %1988 = vmatpush3.msra.mxu0 %v2915_v5  ;;  %1995 = vmatprep.mubr.msk.f32.mxu0 %vm2133_vm0, %v2132_v0 }
 0x19e   :  { %1989 = vmatprep.subr.mxu0 %v2132_v0 }
 0x19f   :  { %1990 = vmatpush3.msra.mxu0 %v2916_v10 }
 0x1a0   :  { %1991 = vmatprep.subr.mxu0 %v2132_v0 }
 0x1a1   :  { %1992 = vmatpush3.msra.mxu0 %v2917_v11 }
 0x1a2   :  { %1993 = vmatprep.subr.mxu0 %v2132_v0 }
 0x1a3   :  { %1994 = vmatpush3.msra.mxu0 %v2918_v17 }
 0x1a4   :  { %1996 = vmatmul.mubr.f32.vlgmr.msra.gmra.mxu0 %v2738_v3 }
 0x21a   :  { %v987_v18 = vpop.f32.mrf.mxu1 }
 0x21c   :  { %v1892_v20 = vpop.f32.mrf.mxu1 }
 0x222   :  { %v836_v21 = vpop.f32.mrf.mxu0 }
 0x223   :  { %v837_v40 = vadd.f32 %v1408_v35, %v836_v21 }
 0x224   :  { %v1857_v25 = vpop.f32.mrf.mxu0 }
 0x225   :  { %v988_v0 = vadd.f32 %v987_v18, %v837_v40 }
 0x23a   :  { %v1180_v27 = vpop.f32.mrf.mxu1 }
 0x23c   :  { %v1962_v28 = vpop.f32.mrf.mxu1 }
 0x243   :  { %v1091_v29 = vpop.f32.mrf.mxu0 }
 0x244   :  { %v1092_v46 = vadd.f32 %v1091_v29, %v988_v0 }
 0x245   :  { %v1927_v34 = vpop.f32.mrf.mxu0 }
 0x246   :  { %v1181_v47 = vadd.f32 %v1180_v27, %v1092_v46 }
 0x25c   :  { %v1386_v43 = vpop.f32.mrf.mxu1 }
 0x25e   :  { %v2032_v45 = vpop.f32.mrf.mxu1 }
 0x264   :  { %v1299_v57 = vpop.f32.mrf.mxu0 }
 0x265   :  { %v1300_v59 = vadd.f32 %v1299_v57, %v1181_v47 }
 0x266   :  { %v1997_v61 = vpop.f32.mrf.mxu0 }
 0x267   :  { %v1387_v62 = vadd.f32 %v1386_v43, %v1300_v59 }
 0x269   :  { %1390 = vst [vmem:[#allocation8] sm:$0xff] %v1387_v62 }
 0x26a   :  { %2112 = shalt.err (!%p2109_p5)
}
 0x26b   :  { %1400 = dma.vmem_to_hbm [thread:$0]  %s1398_s11, 128, %s2910_s5, [#allocation4]  }
 0x26c   :  { %2125 = dma.done.wait [#allocation4], 128  }
 0x26d   :  { %2126 = vsyncadd [#allocation4], 4294967168 }
 0x26e   :  { %1404 = vsyncpa [#allocation3], 1 }
 0x26f   :  { %1405 = vsyncpa [#allocation6], 1 }
 0x270   :  { %1406 = vsyncpa [#allocation4], 1 }

</bundles_post_ra>
